<compile_context>
chip_gen: v7x
topology: tpu7x:2x2x1
jax: 0.10.0
libtpu: 0.0.40
codegen_flags: <defaults>
</compile_context>

<pallas_src>
import math

import jax
import jax.numpy as jnp
from jax.experimental import pallas as pl
from jax.experimental.pallas import tpu as pltpu

_LANE = 128      # vreg lane width
_SUBLANE = 8     # vreg sublane count (f32)


def _round_up(x, m):
    return (x + m - 1) // m * m


# --------------------------------------------------------------------------- #
# Kernel
# --------------------------------------------------------------------------- #
def _make_kernel(state_dim, action_dim):
    in_dim = state_dim + action_dim

    def kernel(sa_ref, w1_ref, b1_ref, w2_ref, b2_ref, w3_ref, b3_ref,
               out_ref, x_scratch):
        """sa_ref: (tb, in_dim) concat(state, action); out_ref: (tb, state_dim).

        The 128-lane padded input tile lives only in the VMEM scratch; HBM
        traffic stays at the narrow logical widths.
        """
        cdt = x_scratch.dtype                      # f32, or bf16 on v6e/v7x

        # Build padded input tile in VMEM: zero padding lanes, drop the concat
        # into lanes [0, in_dim).  (Zeroed every step: scratch is per-core and
        # the grid axis may be sharded across TensorCores; the store overlaps
        # with MXU work.)
        x_scratch[...] = jnp.zeros_like(x_scratch)
        x_scratch[:, 0:in_dim] = sa_ref[...].astype(cdt)
        x = x_scratch[...]

        h = jnp.dot(x, w1_ref[...],
                    preferred_element_type=jnp.float32) + b1_ref[...]
        h = jnp.maximum(h, 0.0)

        h = jnp.dot(h.astype(cdt), w2_ref[...],
                    preferred_element_type=jnp.float32) + b2_ref[...]
        h = jnp.maximum(h, 0.0)

        delta = jnp.dot(h.astype(cdt), w3_ref[...],
                        preferred_element_type=jnp.float32) + b3_ref[...]

        # Residual on the true state lanes only; narrow lane-count store
        # (block covers the full last dim of the (Bp, state_dim) output).
        out_ref[...] = (sa_ref[:, 0:state_dim].astype(jnp.float32)
                        + delta[:, 0:state_dim]).astype(out_ref.dtype)

    return kernel


# --------------------------------------------------------------------------- #
# Parameters
# --------------------------------------------------------------------------- #
def init_params(key, state_dim, action_dim, hidden=100):
    """nn.Linear-style init; weights stored (in_features, out_features)."""
    def linear(k, fan_in, fan_out):
        kw, kb = jax.random.split(k)
        bound = 1.0 / math.sqrt(fan_in)
        w = jax.random.uniform(kw, (fan_in, fan_out), jnp.float32, -bound, bound)
        b = jax.random.uniform(kb, (fan_out,), jnp.float32, -bound, bound)
        return w, b

    k1, k2, k3 = jax.random.split(key, 3)
    w1, b1 = linear(k1, state_dim + action_dim, hidden)
    w2, b2 = linear(k2, hidden, hidden)
    w3, b3 = linear(k3, hidden, state_dim)
    return (w1, b1, w2, b2, w3, b3)


def prepare_params(params, state_dim, action_dim, compute_dtype=jnp.float32):
    """Zero-pad every weight feature axis to a multiple of 128 lanes (once).

    compute_dtype=jnp.bfloat16 halves weight bytes + MXU passes on v6e/v7x
    (f32 accumulate kept); default f32 stays bit-clean vs the reference and is
    the right choice on v5e (no bf16 VPU).
    """
    w1, b1, w2, b2, w3, b3 = params
    in_dim = state_dim + action_dim
    hidden = w1.shape[1]
    fpad = _round_up(in_dim, _LANE)     # padded fc1 input width
    hpad = _round_up(hidden, _LANE)     # padded hidden width (100 -> 128)
    opad = _round_up(state_dim, _LANE)  # padded fc3 output width

    def pad_w(w, rows, cols):
        out = jnp.zeros((rows, cols), compute_dtype)
        return out.at[:w.shape[0], :w.shape[1]].set(w.astype(compute_dtype))

    def pad_b(b, cols):
        out = jnp.zeros((1, cols), jnp.float32)
        return out.at[0, :b.shape[-1]].set(b.reshape(-1).astype(jnp.float32))

    return (pad_w(w1, fpad, hpad), pad_b(b1, hpad),
            pad_w(w2, hpad, hpad), pad_b(b2, hpad),
            pad_w(w3, hpad, opad), pad_b(b3, opad))


# --------------------------------------------------------------------------- #
# Forward wrapper
# --------------------------------------------------------------------------- #
def residual_dynamics_forward(state, action, padded_params, *,
                              max_block_batch=4096, split_threshold=512):
    """state: (..., state_dim), action: (..., action_dim) -> (..., state_dim)."""
    w1p, b1p, w2p, b2p, w3p, b3p = padded_params
    state_dim = state.shape[-1]
    action_dim = action.shape[-1]
    in_dim = state_dim + action_dim
    fpad, hpad = w1p.shape
    opad = w3p.shape[1]

    lead = state.shape[:-1]
    B = math.prod(lead) if lead else 1            # static -> python int (jit-safe)

    s2 = state.reshape(B, state_dim)
    a2 = action.reshape(B, action_dim)
    # Narrow concat only (B x in_dim floats) -- the 128-lane padding happens
    # inside the kernel's VMEM scratch, never in HBM.
    sa = jnp.concatenate([s2, a2], axis=-1)

    # Grid sizing: fewest, fattest steps (<= max_block_batch rows each); when
    # we split, keep the step count EVEN so v7x's two TensorCores balance.
    if B < split_threshold:
        grid_b = 1
    else:
        grid_b = max(2, 2 * pl.cdiv(B, 2 * max_block_batch))
    tb = _round_up(pl.cdiv(B, grid_b), _SUBLANE)
    Bp = tb * grid_b
    if Bp != B:
        sa = jnp.pad(sa, ((0, Bp - B), (0, 0)))   # cheap: narrow rows only

    out_dtype = state.dtype
    cdt = w1p.dtype

    flops = 2 * Bp * (fpad * hpad + hpad * hpad + hpad * opad)
    bytes_accessed = (
        Bp * in_dim * sa.dtype.itemsize
        + sum(int(p.size) * p.dtype.itemsize for p in padded_params)
        + Bp * state_dim * jnp.dtype(out_dtype).itemsize)
    cost = pl.CostEstimate(flops=flops, transcendentals=0,
                           bytes_accessed=bytes_accessed)

    const = lambda i: (0, 0)                       # weights stay VMEM-resident
    kernel = _make_kernel(state_dim, action_dim)

    out = pl.pallas_call(
        kernel,
        out_shape=jax.ShapeDtypeStruct((Bp, state_dim), out_dtype),
        grid_spec=pltpu.PrefetchScalarGridSpec(
            num_scalar_prefetch=0,
            grid=(grid_b,),
            in_specs=[
                pl.BlockSpec((tb, in_dim), lambda i: (i, 0)),
                pl.BlockSpec((fpad, hpad), const),
                pl.BlockSpec((1, hpad), const),
                pl.BlockSpec((hpad, hpad), const),
                pl.BlockSpec((1, hpad), const),
                pl.BlockSpec((hpad, opad), const),
                pl.BlockSpec((1, opad), const),
            ],
            out_specs=pl.BlockSpec((tb, state_dim), lambda i: (i, 0)),
            scratch_shapes=[pltpu.VMEM((tb, fpad), cdt)],
        ),
        compiler_params=pltpu.CompilerParams(
            dimension_semantics=("parallel",),     # shard batch steps over TCs
            vmem_limit_bytes=32 * 1024 * 1024),    # headroom on v5e's 16MiB default
        cost_estimate=cost,
    )(sa, w1p, b1p, w2p, b2p, w3p, b3p)

    out = out[:B]                                  # drop row padding (narrow)
    return out.reshape(*lead, state_dim)


# --------------------------------------------------------------------------- #
# Pure-JAX reference (validation)
# --------------------------------------------------------------------------- #
def _reference_forward(state, action, raw_params):
    w1, b1, w2, b2, w3, b3 = raw_params
    x = jnp.concatenate([state, action], axis=-1)
    x = jnp.maximum(x @ w1 + b1, 0.0)
    x = jnp.maximum(x @ w2 + b2, 0.0)
    delta = x @ w3 + b3
    return state + delta


if __name__ == "__main__":
    state_dim, action_dim = 3, 3
    batch = 8

    key = jax.random.PRNGKey(0)
    kp, ks, ka = jax.random.split(key, 3)

    raw_params = init_params(kp, state_dim, action_dim, hidden=100)
    params = prepare_params(raw_params, state_dim, action_dim,
                            compute_dtype=jnp.float32)

    state = jax.random.normal(ks, (batch, state_dim), jnp.float32)
    action = jax.random.normal(ka, (batch, action_dim), jnp.float32)

    fwd = jax.jit(lambda s, a: residual_dynamics_forward(s, a, params))
    out = jax.block_until_ready(fwd(state, action))
    ref = _reference_forward(state, action, raw_params)
    assert out.shape == (batch, state_dim)
    assert jnp.allclose(out, ref, atol=1e-4, rtol=1e-4), \
        "mismatch vs reference (small batch)"

    # Rollout-style leading dims (1200 rows) -> exercises the even, parallel
    # multi-step grid path.
    kbs, kba = jax.random.split(ka)
    state_big = jax.random.normal(kbs, (4, 300, state_dim), jnp.float32)
    action_big = jax.random.normal(kba, (4, 300, action_dim), jnp.float32)
    fwd_big = jax.jit(lambda s, a: residual_dynamics_forward(s, a, params))
    out_big = jax.block_until_ready(fwd_big(state_big, action_big))
    ref_big = _reference_forward(state_big, action_big, raw_params)
    assert out_big.shape == (4, 300, state_dim)
    assert jnp.allclose(out_big, ref_big, atol=1e-4, rtol=1e-4), \
        "mismatch vs reference (grid path)"

    print("KERNEL_OK")
</pallas_src>

<mosaic_0001>
module attributes {stable_mosaic.version = 11 : i64} {
  func.func @kernel(%arg0: i32, %arg1: memref<8x6xf32, #tpu.memory_space<vmem>>, %arg2: memref<128x128xf32, #tpu.memory_space<vmem>>, %arg3: memref<1x128xf32, #tpu.memory_space<vmem>>, %arg4: memref<128x128xf32, #tpu.memory_space<vmem>>, %arg5: memref<1x128xf32, #tpu.memory_space<vmem>>, %arg6: memref<128x128xf32, #tpu.memory_space<vmem>>, %arg7: memref<1x128xf32, #tpu.memory_space<vmem>>, %arg8: memref<8x3xf32, #tpu.memory_space<vmem>>, %arg9: memref<8x128xf32, #tpu.memory_space<vmem>>) attributes {dimension_semantics = [#tpu.dimension_semantics<parallel>], iteration_bounds = array<i64: 1>, scalar_prefetch = 0 : i64, scratch_operands = 1 : i64, tpu.core_type = #tpu.core_type<tc>, window_params = [{transform_indices = @transform_0, window_bounds = array<i64: 8, 6>}, {pipeline_mode = #tpu.pipeline_mode<synchronous>, transform_indices = @transform_1, window_bounds = array<i64: 128, 128>}, {pipeline_mode = #tpu.pipeline_mode<synchronous>, transform_indices = @transform_2, window_bounds = array<i64: 1, 128>}, {pipeline_mode = #tpu.pipeline_mode<synchronous>, transform_indices = @transform_3, window_bounds = array<i64: 128, 128>}, {pipeline_mode = #tpu.pipeline_mode<synchronous>, transform_indices = @transform_4, window_bounds = array<i64: 1, 128>}, {pipeline_mode = #tpu.pipeline_mode<synchronous>, transform_indices = @transform_5, window_bounds = array<i64: 128, 128>}, {pipeline_mode = #tpu.pipeline_mode<synchronous>, transform_indices = @transform_6, window_bounds = array<i64: 1, 128>}, {transform_indices = @transform_7, window_bounds = array<i64: 8, 3>}]} {
    %cst = arith.constant 0.000000e+00 : f32
    %0 = vector.broadcast %cst : f32 to vector<8x128xf32>
    %c0 = arith.constant 0 : index
    %c0_0 = arith.constant 0 : index
    %1 = vector.load %arg9[%c0, %c0_0] : memref<8x128xf32, #tpu.memory_space<vmem>>, vector<8x128xf32>
    tpu.vector_store %arg9[%c0, %c0_0], %0 {strides = array<i32>} : memref<8x128xf32, #tpu.memory_space<vmem>>, vector<8x128xf32>,
    %c0_1 = arith.constant 0 : index
    %c0_2 = arith.constant 0 : index
    %2 = vector.load %arg1[%c0_1, %c0_2] : memref<8x6xf32, #tpu.memory_space<vmem>>, vector<8x6xf32>
    %c0_3 = arith.constant 0 : index
    %c0_4 = arith.constant 0 : index
    %3 = vector.load %arg9[%c0_3, %c0_4] : memref<8x128xf32, #tpu.memory_space<vmem>>, vector<8x6xf32>
    tpu.vector_store %arg9[%c0_3, %c0_4], %2 {strides = array<i32>} : memref<8x128xf32, #tpu.memory_space<vmem>>, vector<8x6xf32>,
    %c0_5 = arith.constant 0 : index
    %c0_6 = arith.constant 0 : index
    %4 = vector.load %arg9[%c0_5, %c0_6] : memref<8x128xf32, #tpu.memory_space<vmem>>, vector<8x128xf32>
    %c0_7 = arith.constant 0 : index
    %c0_8 = arith.constant 0 : index
    %5 = vector.load %arg2[%c0_7, %c0_8] : memref<128x128xf32, #tpu.memory_space<vmem>>, vector<128x128xf32>
    %cst_9 = arith.constant dense<0.000000e+00> : vector<8x128xf32>
    %6 = tpu.matmul %4, %5, %cst_9 {dimension_numbers = #tpu.dot_dimension_numbers<[1], [0], [0], [1], [0, 0, 1, 1], [], []>} : vector<8x128xf32>, vector<128x128xf32>, vector<8x128xf32> -> vector<8x128xf32>
    %c0_10 = arith.constant 0 : index
    %c0_11 = arith.constant 0 : index
    %7 = vector.load %arg3[%c0_10, %c0_11] : memref<1x128xf32, #tpu.memory_space<vmem>>, vector<1x128xf32>
    %8 = vector.broadcast %7 : vector<1x128xf32> to vector<8x128xf32>
    %9 = arith.addf %6, %8 : vector<8x128xf32>
    %cst_12 = arith.constant 0.000000e+00 : f32
    %10 = vector.broadcast %cst_12 : f32 to vector<8x128xf32>
    %11 = arith.maximumf %9, %10 : vector<8x128xf32>
    %c0_13 = arith.constant 0 : index
    %c0_14 = arith.constant 0 : index
    %12 = vector.load %arg4[%c0_13, %c0_14] : memref<128x128xf32, #tpu.memory_space<vmem>>, vector<128x128xf32>
    %cst_15 = arith.constant dense<0.000000e+00> : vector<8x128xf32>
    %13 = tpu.matmul %11, %12, %cst_15 {dimension_numbers = #tpu.dot_dimension_numbers<[1], [0], [0], [1], [0, 0, 1, 1], [], []>} : vector<8x128xf32>, vector<128x128xf32>, vector<8x128xf32> -> vector<8x128xf32>
    %c0_16 = arith.constant 0 : index
    %c0_17 = arith.constant 0 : index
    %14 = vector.load %arg5[%c0_16, %c0_17] : memref<1x128xf32, #tpu.memory_space<vmem>>, vector<1x128xf32>
    %15 = vector.broadcast %14 : vector<1x128xf32> to vector<8x128xf32>
    %16 = arith.addf %13, %15 : vector<8x128xf32>
    %cst_18 = arith.constant 0.000000e+00 : f32
    %17 = vector.broadcast %cst_18 : f32 to vector<8x128xf32>
    %18 = arith.maximumf %16, %17 : vector<8x128xf32>
    %c0_19 = arith.constant 0 : index
    %c0_20 = arith.constant 0 : index
    %19 = vector.load %arg6[%c0_19, %c0_20] : memref<128x128xf32, #tpu.memory_space<vmem>>, vector<128x128xf32>
    %cst_21 = arith.constant dense<0.000000e+00> : vector<8x128xf32>
    %20 = tpu.matmul %18, %19, %cst_21 {dimension_numbers = #tpu.dot_dimension_numbers<[1], [0], [0], [1], [0, 0, 1, 1], [], []>} : vector<8x128xf32>, vector<128x128xf32>, vector<8x128xf32> -> vector<8x128xf32>
    %c0_22 = arith.constant 0 : index
    %c0_23 = arith.constant 0 : index
    %21 = vector.load %arg7[%c0_22, %c0_23] : memref<1x128xf32, #tpu.memory_space<vmem>>, vector<1x128xf32>
    %22 = vector.broadcast %21 : vector<1x128xf32> to vector<8x128xf32>
    %23 = arith.addf %20, %22 : vector<8x128xf32>
    %c0_24 = arith.constant 0 : index
    %c0_25 = arith.constant 0 : index
    %24 = vector.load %arg1[%c0_24, %c0_25] : memref<8x6xf32, #tpu.memory_space<vmem>>, vector<8x3xf32>
    %25 = vector.extract_strided_slice %23 {offsets = [0, 0], sizes = [8, 3], strides = [1, 1]} : vector<8x128xf32> to vector<8x3xf32>
    %26 = arith.addf %24, %25 : vector<8x3xf32>
    %c0_26 = arith.constant 0 : index
    %c0_27 = arith.constant 0 : index
    %27 = vector.load %arg8[%c0_26, %c0_27] : memref<8x3xf32, #tpu.memory_space<vmem>>, vector<8x3xf32>
    tpu.vector_store %arg8[%c0_26, %c0_27], %26 {strides = array<i32>} : memref<8x3xf32, #tpu.memory_space<vmem>>, vector<8x3xf32>,
    return
  }
  func.func @transform_0(%arg0: i32) -> (i32, i32) {
    %c0_i32 = arith.constant 0 : i32
    %c0_i32_0 = arith.constant 0 : i32
    return %arg0, %c0_i32 : i32, i32
  }
  func.func @transform_1(%arg0: i32) -> (i32, i32) {
    %c0_i32 = arith.constant 0 : i32
    %c0_i32_0 = arith.constant 0 : i32
    %c0_i32_1 = arith.constant 0 : i32
    return %c0_i32, %c0_i32_0 : i32, i32
  }
  func.func @transform_2(%arg0: i32) -> (i32, i32) {
    %c0_i32 = arith.constant 0 : i32
    %c0_i32_0 = arith.constant 0 : i32
    %c0_i32_1 = arith.constant 0 : i32
    return %c0_i32, %c0_i32_0 : i32, i32
  }
  func.func @transform_3(%arg0: i32) -> (i32, i32) {
    %c0_i32 = arith.constant 0 : i32
    %c0_i32_0 = arith.constant 0 : i32
    %c0_i32_1 = arith.constant 0 : i32
    return %c0_i32, %c0_i32_0 : i32, i32
  }
  func.func @transform_4(%arg0: i32) -> (i32, i32) {
    %c0_i32 = arith.constant 0 : i32
    %c0_i32_0 = arith.constant 0 : i32
    %c0_i32_1 = arith.constant 0 : i32
    return %c0_i32, %c0_i32_0 : i32, i32
  }
  func.func @transform_5(%arg0: i32) -> (i32, i32) {
    %c0_i32 = arith.constant 0 : i32
    %c0_i32_0 = arith.constant 0 : i32
    %c0_i32_1 = arith.constant 0 : i32
    return %c0_i32, %c0_i32_0 : i32, i32
  }
  func.func @transform_6(%arg0: i32) -> (i32, i32) {
    %c0_i32 = arith.constant 0 : i32
    %c0_i32_0 = arith.constant 0 : i32
    %c0_i32_1 = arith.constant 0 : i32
    return %c0_i32, %c0_i32_0 : i32, i32
  }
  func.func @transform_7(%arg0: i32) -> (i32, i32) {
    %c0_i32 = arith.constant 0 : i32
    %c0_i32_0 = arith.constant 0 : i32
    return %arg0, %c0_i32 : i32, i32
  }
}

</mosaic_0001>

<bundles_post_ra>
// kernel: _lambda_.1
= control target key start
LH: loop header
LB: loop body
LE: loop exit
PB: predicated region body
PF: predicated region fallthrough
CT: control target
= control target key end

     0   :  { %12 = vsyncpa [#allocation4], 0  ;;  %s822_s0 = inlined_call_operand.vmem [shape: f32[8,6], index: 0, kind: input, shape index: {}]   ;;  %s823_s1 = inlined_call_operand.hbm [shape: f32[128,128], index: 1, kind: input, shape index: {}]   ;;  %s824_s2 = inlined_call_operand.vmem [shape: f32[1,128], index: 2, kind: input, shape index: {}]   ;;  %s825_s3 = inlined_call_operand.hbm [shape: f32[128,128], index: 3, kind: input, shape index: {}]   ;;  %s826_s4 = inlined_call_operand.vmem [shape: f32[1,128], index: 4, kind: input, shape index: {}]   ;;  %s827_s5 = inlined_call_operand.hbm [shape: f32[128,128], index: 5, kind: input, shape index: {}]   ;;  %s828_s6 = inlined_call_operand.vmem [shape: f32[1,128], index: 6, kind: input, shape index: {}]   ;;  %s829_s7 = inlined_call_operand.vmem [shape: f32[8,3], index: 7, kind: output, shape index: {}]  }
   0x1   :  { %13 = vsyncpa [#allocation6], 0  ;;  %s672_s24 = smov [#allocation5]   ;;  %s673_s26 = smov [#allocation3]  }
   0x2   :  { %s35_s25 = sshll.u32 %s672_s24, 4  ;;  %s21_s27 = sshll.u32 %s673_s26, 4  ;;  %s36_s25 = int_to_ptr.vmem [resolvable:$true] %s35_s25  ;;  %s720_s27 = int_to_ptr.vmem [resolvable:$true] %s21_s27 }
   0x3   :  { %s602_s30 = scalar_lea.hbm %s825_s3, 2048 }
   0x4   :  { %p603_p0 = scmp.ne.s32.totalorder %s825_s3, %s602_s30  ;;  %p606_p1 = scmp.lt.u32.totalorder %s602_s30, %s825_s3 }
   0x6   :  { %p608_p2 = pnand %p606_p1, %p603_p0 }
   0x8   :  { %611 = shalt.err (!%p608_p2)
}
   0x9   :  { %s612_s12 = scalar_lea.vmem %s36_s25, 2048  ;;  %p617_p4 = scmp.lt.s32.totalorder %s36_s25, %s36_s25 }
   0xa   :  { %p613_p3 = scmp.ne.s32.totalorder %s36_s25, %s612_s12  ;;  %p618_p5 = scmp.lt.s32.totalorder %s612_s12, %s612_s12 }
   0xc   :  { %p619_p6 = por %p618_p5, %p617_p4 }
   0xe   :  { %p620_p7 = pnand %p619_p6, %p613_p3 }
  0x10   :  { %623 = shalt.err (!%p620_p7)
}
  0x11   :  { %s674_s13 = smov 128   ;;  %s675_s14 = smov 8  }
  0x12   :  { %41 = dma.hbm_to_vmem [thread:$0]  %s825_s3, 2048, %s36_s25, [#allocation6], %s674_s13, %s674_s13, %s675_s14  }
  0x13   :  { %s624_s19 = scalar_lea.hbm %s823_s1, 2048 }
  0x14   :  { %p625_p8 = scmp.ne.s32.totalorder %s823_s1, %s624_s19  ;;  %p628_p9 = scmp.lt.u32.totalorder %s624_s19, %s823_s1 }
  0x16   :  { %p630_p10 = pnand %p628_p9, %p625_p8 }
  0x18   :  { %633 = shalt.err (!%p630_p10)
}
  0x19   :  { %s634_s24 = scalar_lea.vmem %s720_s27, 2048  ;;  %p639_p12 = scmp.lt.s32.totalorder %s720_s27, %s720_s27 }
  0x1a   :  { %p635_p11 = scmp.ne.s32.totalorder %s720_s27, %s634_s24  ;;  %p640_p13 = scmp.lt.s32.totalorder %s634_s24, %s634_s24 }
  0x1c   :  { %p641_p0 = por %p640_p13, %p639_p12 }
  0x1e   :  { %p642_p1 = pnand %p641_p0, %p635_p11 }
  0x20   :  { %645 = shalt.err (!%p642_p1)
}
  0x21   :  { %27 = dma.hbm_to_vmem [thread:$0]  %s823_s1, 2048, %s720_s27, [#allocation4], %s674_s13, %s674_s13, %s675_s14  }
  0x22   :  { %s676_s26 = smov [#allocation7]   ;;  %s646_s8 = scalar_lea.hbm %s827_s5, 2048 }
  0x23   :  { %s49_s28 = sshll.u32 %s676_s26, 4  ;;  %p647_p2 = scmp.ne.s32.totalorder %s827_s5, %s646_s8  ;;  %s50_s28 = int_to_ptr.vmem [resolvable:$true] %s49_s28 }
  0x24   :  { %p650_p3 = scmp.lt.u32.totalorder %s646_s8, %s827_s5 }
  0x26   :  { %p652_p4 = pnand %p650_p3, %p647_p2 }
  0x28   :  { %655 = shalt.err (!%p652_p4)
}
  0x29   :  { %s656_s15 = scalar_lea.vmem %s50_s28, 2048  ;;  %p661_p6 = scmp.lt.s32.totalorder %s50_s28, %s50_s28 }
  0x2a   :  { %p657_p5 = scmp.ne.s32.totalorder %s50_s28, %s656_s15  ;;  %p662_p7 = scmp.lt.s32.totalorder %s656_s15, %s656_s15 }
  0x2c   :  { %p663_p8 = por %p662_p7, %p661_p6 }
  0x2e   :  { %p664_p9 = pnand %p663_p8, %p657_p5 }
  0x30   :  { %667 = shalt.err (!%p664_p9)
}
  0x31   :  { %55 = dma.hbm_to_vmem [thread:$0]  %s827_s5, 2048, %s50_s28, [#allocation6], %s674_s13, %s674_s13, %s675_s14  }
  0x32   :  { %668 = dma.done.wait [#allocation4], 2048  }
  0x33   :  { %669 = vsyncadd [#allocation4], 4294965248 }
  0x34   :  { %670 = dma.done.wait [#allocation6], 4096  }
  0x35   :  { %671 = vsyncadd [#allocation6], 4294963200  ;;  %v677_v0 = vmov 0.0|0.0   ;;  %v678_v1 = vmov 0.0   ;;  %vm679_vm0 = vmmov 0   ;;  %v72_v2 = vld [vmem:[#allocation3] sm:$0xff] }
  0x36   :  { %522 = vmatprep.subr.bf16.mxu0 %v677_v0  ;;  %67 = vst [vmem:[#allocation2] sm:$0xff] %v678_v1  ;;  %449 = vmatprep.mubr.msk.f32.mxu0 %vm679_vm0, %v678_v1  ;;  %v73_v3 = vld [vmem:[#allocation3 + $0x8] sm:$0xff]  ;;  %v74_v4 = vld [vmem:[#allocation3 + $0x10] sm:$0xff]  ;;  %v75_v6 = vld [vmem:[#allocation3 + $0x18] sm:$0xff]  ;;  %vm69_vm1 = vcmask 48128   ;;  %vm355_vm2 = vcmask 23552  }
  0x37   :  { %546 = vmatprep.subr.bf16.mxu1 %v677_v0  ;;  %484 = vmatprep.mubr.msk.f32.mxu1 %vm679_vm0, %v678_v1  ;;  %v523_v5 = vpack.c.bf16 %v73_v3, %v72_v2  ;;  %v526_v7 = vpack.c.bf16 %v75_v6, %v74_v4  ;;  %v76_v8 = vld [vmem:[#allocation3 + $0x20] sm:$0xff]  ;;  %v77_v9 = vld [vmem:[#allocation3 + $0x28] sm:$0xff]  ;;  %v783_v10 = vld [vmem:[%s822_s0] sm:$0xff] }
  0x38   :  { %v166_v11 = vld [vmem:[#allocation5] sm:$0xff]  ;;  %70 = vst.msk [vmem:[#allocation2] sm:$0xff] %vm69_vm1, %v783_v10  ;;  %v167_v12 = vld [vmem:[#allocation5 + $0x8] sm:$0xff]  ;;  %v168_v13 = vld [vmem:[#allocation5 + $0x10] sm:$0xff]  ;;  %v529_v15 = vpack.c.bf16 %v77_v9, %v76_v8 }
  0x39   :  { %524 = vmatpush3.bf16.msra.mxu0 %v523_v5  ;;  %v169_v14 = vld [vmem:[#allocation5 + $0x18] sm:$0xff]  ;;  %v547_v16 = vpack.c.bf16 %v167_v12, %v166_v11  ;;  %v78_v17 = vld [vmem:[#allocation3 + $0x30] sm:$0xff]  ;;  %v170_v20 = vld [vmem:[#allocation5 + $0x20] sm:$0xff] }
  0x3a   :  { %525 = vmatprep.subr.bf16.mxu0 %v677_v0  ;;  %v79_v18 = vld [vmem:[#allocation3 + $0x38] sm:$0xff]  ;;  %v550_v19 = vpack.c.bf16 %v169_v14, %v168_v13  ;;  %v171_v21 = vld [vmem:[#allocation5 + $0x28] sm:$0xff]  ;;  %v80_v23 = vld [vmem:[#allocation3 + $0x40] sm:$0xff] }
  0x3b   :  { %548 = vmatpush3.bf16.msra.mxu1 %v547_v16  ;;  %v532_v22 = vpack.c.bf16 %v79_v18, %v78_v17  ;;  %v81_v24 = vld [vmem:[#allocation3 + $0x48] sm:$0xff]  ;;  %v553_v25 = vpack.c.bf16 %v171_v21, %v170_v20  ;;  %v172_v26 = vld [vmem:[#allocation5 + $0x30] sm:$0xff]  ;;  %v173_v27 = vld [vmem:[#allocation5 + $0x38] sm:$0xff] }
  0x3c   :  { %549 = vmatprep.subr.bf16.mxu1 %v677_v0  ;;  %v535_v28 = vpack.c.bf16 %v81_v24, %v80_v23  ;;  %v82_v29 = vld [vmem:[#allocation3 + $0x50] sm:$0xff]  ;;  %v83_v30 = vld [vmem:[#allocation3 + $0x58] sm:$0xff]  ;;  %v556_v31 = vpack.c.bf16 %v173_v27, %v172_v26  ;;  %v174_v32 = vld [vmem:[#allocation5 + $0x40] sm:$0xff] }
  0x3d   :  { %527 = vmatpush3.bf16.msra.mxu0 %v526_v7  ;;  %v175_v33 = vld [vmem:[#allocation5 + $0x48] sm:$0xff]  ;;  %v538_v34 = vpack.c.bf16 %v83_v30, %v82_v29  ;;  %v84_v35 = vld [vmem:[#allocation3 + $0x60] sm:$0xff]  ;;  %v176_v38 = vld [vmem:[#allocation5 + $0x50] sm:$0xff] }
  0x3e   :  { %528 = vmatprep.subr.bf16.mxu0 %v677_v0  ;;  %v85_v36 = vld [vmem:[#allocation3 + $0x68] sm:$0xff]  ;;  %v559_v37 = vpack.c.bf16 %v175_v33, %v174_v32  ;;  %v177_v39 = vld [vmem:[#allocation5 + $0x58] sm:$0xff]  ;;  %v86_v41 = vld [vmem:[#allocation3 + $0x70] sm:$0xff] }
  0x3f   :  { %551 = vmatpush3.bf16.msra.mxu1 %v550_v19  ;;  %v541_v40 = vpack.c.bf16 %v85_v36, %v84_v35  ;;  %v87_v42 = vld [vmem:[#allocation3 + $0x78] sm:$0xff]  ;;  %v562_v43 = vpack.c.bf16 %v177_v39, %v176_v38  ;;  %v178_v44 = vld [vmem:[#allocation5 + $0x60] sm:$0xff]  ;;  %v179_v45 = vld [vmem:[#allocation5 + $0x68] sm:$0xff] }
  0x40   :  { %552 = vmatprep.subr.bf16.mxu1 %v677_v0  ;;  %v544_v46 = vpack.c.bf16 %v87_v42, %v86_v41  ;;  %v565_v47 = vpack.c.bf16 %v179_v45, %v178_v44  ;;  %v71_v48 = vld [vmem:[#allocation2] sm:$0xff]  ;;  %v180_v49 = vld [vmem:[#allocation5 + $0x70] sm:$0xff]  ;;  %v260_v52 = vld [vmem:[#allocation7] sm:$0xff] }
  0x41   :  { %530 = vmatpush3.bf16.msra.mxu0 %v529_v15  ;;  %v181_v50 = vld [vmem:[#allocation5 + $0x78] sm:$0xff]  ;;  %v261_v53 = vld [vmem:[#allocation7 + $0x8] sm:$0xff]  ;;  %v262_v54 = vld [vmem:[#allocation7 + $0x10] sm:$0xff] }
  0x42   :  { %531 = vmatprep.subr.bf16.mxu0 %v677_v0  ;;  %v568_v51 = vpack.c.bf16 %v181_v50, %v180_v49  ;;  %v571_v55 = vpack.c.bf16 %v261_v53, %v260_v52  ;;  %v263_v56 = vld [vmem:[#allocation7 + $0x18] sm:$0xff]  ;;  %v264_v58 = vld [vmem:[#allocation7 + $0x20] sm:$0xff]  ;;  %v265_v59 = vld [vmem:[#allocation7 + $0x28] sm:$0xff] }
  0x43   :  { %554 = vmatpush3.bf16.msra.mxu1 %v553_v25  ;;  %v574_v57 = vpack.c.bf16 %v263_v56, %v262_v54  ;;  %v577_v60 = vpack.c.bf16 %v265_v59, %v264_v58  ;;  %v266_v61 = vld [vmem:[#allocation7 + $0x30] sm:$0xff]  ;;  %v267_v62 = vld [vmem:[#allocation7 + $0x38] sm:$0xff]  ;;  %v269_v2 = vld [vmem:[#allocation7 + $0x48] sm:$0xff] }
  0x44   :  { %555 = vmatprep.subr.bf16.mxu1 %v677_v0  ;;  %v580_v63 = vpack.c.bf16 %v267_v62, %v266_v61  ;;  %v270_v4 = vld [vmem:[#allocation7 + $0x50] sm:$0xff]  ;;  %v271_v5 = vld [vmem:[#allocation7 + $0x58] sm:$0xff]  ;;  %v272_v7 = vld [vmem:[#allocation7 + $0x60] sm:$0xff] }
  0x45   :  { %533 = vmatpush3.bf16.msra.mxu0 %v532_v22  ;;  %v586_v6 = vpack.c.bf16 %v271_v5, %v270_v4  ;;  %v273_v8 = vld [vmem:[#allocation7 + $0x68] sm:$0xff]  ;;  %v363_v11 = vld [vmem:[%s824_s2] ss:$0 sm:$0xff]  ;;  %v274_v16 = vld [vmem:[#allocation7 + $0x70] sm:$0xff] }
  0x46   :  { %534 = vmatprep.subr.bf16.mxu0 %v677_v0  ;;  %v589_v9 = vpack.c.bf16 %v273_v8, %v272_v7  ;;  %v275_v17 = vld [vmem:[#allocation7 + $0x78] sm:$0xff] }
  0x47   :  { %557 = vmatpush3.bf16.msra.mxu1 %v556_v31  ;;  %v592_v18 = vpack.c.bf16 %v275_v17, %v274_v16  ;;  %v364_v19 = vld [vmem:[%s826_s4] ss:$0 sm:$0xff] }
  0x48   :  { %558 = vmatprep.subr.bf16.mxu1 %v677_v0  ;;  %v365_v23 = vld [vmem:[%s828_s6] ss:$0 sm:$0xff] }
  0x49   :  { %536 = vmatpush3.bf16.msra.mxu0 %v535_v28 }
  0x4a   :  { %537 = vmatprep.subr.bf16.mxu0 %v677_v0 }
  0x4b   :  { %560 = vmatpush3.bf16.msra.mxu1 %v559_v37 }
  0x4c   :  { %561 = vmatprep.subr.bf16.mxu1 %v677_v0 }
  0x4d   :  { %539 = vmatpush3.bf16.msra.mxu0 %v538_v34 }
  0x4e   :  { %540 = vmatprep.subr.bf16.mxu0 %v677_v0 }
  0x4f   :  { %563 = vmatpush3.bf16.msra.mxu1 %v562_v43 }
  0x50   :  { %564 = vmatprep.subr.bf16.mxu1 %v677_v0 }
  0x51   :  { %542 = vmatpush3.bf16.msra.mxu0 %v541_v40 }
  0x52   :  { %543 = vmatprep.subr.bf16.mxu0 %v677_v0 }
  0x53   :  { %566 = vmatpush3.bf16.msra.mxu1 %v565_v47 }
  0x54   :  { %567 = vmatprep.subr.bf16.mxu1 %v677_v0 }
  0x55   :  { %545 = vmatpush3.bf16.msra.mxu0 %v544_v46 }
  0x56   :  { %570 = vmatprep.subr.bf16.mxu0 %v677_v0 }
  0x57   :  { %569 = vmatpush3.bf16.msra.mxu1 %v568_v51 }
  0x58   :  { %450 = vmatmul.mubr.f32.vlgmr.msra.gmra.mrb[0].mxu0 %v71_v48 }
  0x59   :  { %519 = vmatprep.mubr.msk.f32.mxu0 %vm679_vm0, %v678_v1  ;;  %572 = vmatpush3.bf16.msra.mxu0 %v571_v55  ;;  %v268_v1 = vld [vmem:[#allocation7 + $0x40] sm:$0xff] }
  0x5a   :  { %573 = vmatprep.subr.bf16.mxu0 %v677_v0  ;;  %v583_v3 = vpack.c.bf16 %v269_v2, %v268_v1 }
  0x5d   :  { %575 = vmatpush3.bf16.msra.mxu0 %v574_v57 }
  0x5e   :  { %576 = vmatprep.subr.bf16.mxu0 %v677_v0 }
  0x61   :  { %578 = vmatpush3.bf16.msra.mxu0 %v577_v60 }
  0x62   :  { %579 = vmatprep.subr.bf16.mxu0 %v677_v0 }
  0x65   :  { %581 = vmatpush3.bf16.msra.mxu0 %v580_v63 }
  0x66   :  { %582 = vmatprep.subr.bf16.mxu0 %v677_v0 }
  0x69   :  { %584 = vmatpush3.bf16.msra.mxu0 %v583_v3 }
  0x6a   :  { %585 = vmatprep.subr.bf16.mxu0 %v677_v0 }
  0x6d   :  { %587 = vmatpush3.bf16.msra.mxu0 %v586_v6 }
  0x6e   :  { %588 = vmatprep.subr.bf16.mxu0 %v677_v0 }
  0x71   :  { %590 = vmatpush3.bf16.msra.mxu0 %v589_v9 }
  0x72   :  { %591 = vmatprep.subr.bf16.mxu0 %v677_v0 }
  0x75   :  { %593 = vmatpush3.bf16.msra.mxu0 %v592_v18 }
 0x12b   :  { %v161_v12 = vpop.f32.mrb[0].mxu0 }
 0x12c   :  { %v162_v13 = vadd.f32 %v363_v11, %v161_v12  ;;  %v451_v14 = vpop.f32.mrb[1].mxu0 }
 0x12e   :  { %v165_v15 = vmax.f32 %v162_v13, 0.0 }
 0x130   :  { %485 = vmatmul.mubr.f32.vlgmr.msra.gmra.mrb[0].mxu1 %v165_v15 }
 0x203   :  { %v255_v20 = vpop.f32.mrb[0].mxu1 }
 0x204   :  { %v256_v21 = vadd.f32 %v364_v19, %v255_v20  ;;  %v486_v0 = vpop.f32.mrb[1].mxu1 }
 0x206   :  { %v259_v22 = vmax.f32 %v256_v21, 0.0 }
 0x208   :  { %520 = vmatmul.mubr.f32.vlgmr.msra.gmra.mrb[2].mxu0 %v259_v22 }
 0x2db   :  { %v349_v24 = vpop.f32.mrb[2].mxu0 }
 0x2dc   :  { %v350_v25 = vadd.f32 %v365_v23, %v349_v24  ;;  %v521_v26 = vpop.f32.mrb[3].mxu0 }
 0x2de   :  { %v354_v27 = vadd.f32 %v350_v25, %v783_v10 }
 0x2e0   :  { %356 = vst.msk [vmem:[%s829_s7] sm:$0xff] %vm355_vm2, %v354_v27 }
 0x2e1   :  { %361 = vsyncpa [#allocation4], 1 }
 0x2e2   :  { %362 = vsyncpa [#allocation6], 1 }

</bundles_post_ra>
